<compile_context>
chip_gen: v7x
topology: tpu7x:2x2x1
jax: 0.10.0
libtpu: 0.0.40
codegen_flags: <defaults>
</compile_context>

<pallas_src>
import math

import jax
import jax.numpy as jnp
from jax.experimental import pallas as pl
from jax.experimental.pallas import tpu as pltpu


def _round_up(x, m):
    return ((x + m - 1) // m) * m


def _mlp_kernel(x_ref, w1_ref, b1_ref, w2_ref, b2_ref, w3_ref, b3_ref,
                o_ref, h1_ref):
    # Layer 0: Linear(input_dim, H1p) + ReLU   (bf16 MXU, f32 accumulate)
    x = x_ref[...].astype(jnp.bfloat16)
    h1 = jnp.dot(x, w1_ref[...], preferred_element_type=jnp.float32)
    h1 = jnp.maximum(h1 + b1_ref[...], 0.0)
    # Stage the big intermediate in VMEM (bf16) instead of spilling vregs.
    h1_ref[...] = h1.astype(jnp.bfloat16)
    # Layer 1: Linear(H1p, H2p) + ReLU
    h2 = jnp.dot(h1_ref[...], w2_ref[...], preferred_element_type=jnp.float32)
    h2 = jnp.maximum(h2 + b2_ref[...], 0.0)
    # Output layer: Linear(H2p, n_cls), no activation.
    out = jnp.dot(h2.astype(jnp.bfloat16), w3_ref[...],
                  preferred_element_type=jnp.float32)
    o_ref[...] = (out + b3_ref[...]).astype(o_ref.dtype)


def incoming_noisy_mlp_forward(x, packed_params, *, tm_max=256):
    """x: [B, C, H, W] (NCHW, like PyTorch). Returns logits [B, n_cls] f32."""
    B = x.shape[0]
    x2d = x.reshape(B, -1)          # == x.view(B, -1); dtype cast done in-kernel
    F = x2d.shape[1]

    w1, b1, w2, b2, w3, b3 = packed_params
    H1P = w1.shape[1]
    H2P = w2.shape[1]
    n_cls = w3.shape[1]

    # Batch tiling: rows padded to a multiple of 8 sublanes; tile capped at
    # tm_max rows (multiple of 128 -> feeds all MXUs on v5e too).
    if B <= tm_max:
        b_pad = _round_up(B, 8)
    else:
        b_pad = _round_up(B, tm_max)
    tm = min(tm_max, b_pad)
    if b_pad != B:
        x2d = jnp.pad(x2d, ((0, b_pad - B), (0, 0)))
    grid = (b_pad // tm,)

    flops = 2 * b_pad * (F * H1P + H1P * H2P + H2P * n_cls)
    bytes_accessed = (
        int(x2d.size) * x2d.dtype.itemsize
        + sum(int(p.size) * p.dtype.itemsize for p in packed_params)
        + b_pad * n_cls * 4)

    out = pl.pallas_call(
        _mlp_kernel,
        out_shape=jax.ShapeDtypeStruct((b_pad, n_cls), jnp.float32),
        grid_spec=pltpu.PrefetchScalarGridSpec(
            num_scalar_prefetch=0,
            grid=grid,
            in_specs=[
                pl.BlockSpec((tm, F), lambda i: (i, 0)),    # x tile (pipelined)
                pl.BlockSpec((F, H1P), lambda i: (0, 0)),   # weights resident
                pl.BlockSpec((1, H1P), lambda i: (0, 0)),
                pl.BlockSpec((H1P, H2P), lambda i: (0, 0)),
                pl.BlockSpec((1, H2P), lambda i: (0, 0)),
                pl.BlockSpec((H2P, n_cls), lambda i: (0, 0)),
                pl.BlockSpec((1, n_cls), lambda i: (0, 0)),
            ],
            out_specs=pl.BlockSpec((tm, n_cls), lambda i: (i, 0)),
            scratch_shapes=[pltpu.VMEM((tm, H1P), jnp.bfloat16)],
        ),
        compiler_params=pltpu.CompilerParams(
            dimension_semantics=("parallel",)),
        cost_estimate=pl.CostEstimate(
            flops=flops, transcendentals=0, bytes_accessed=bytes_accessed),
    )(x2d, w1, b1, w2, b2, w3, b3)

    return out[:B] if b_pad != B else out


def init_params(key, input_dim, layer_dims, n_cls):
    """PyTorch-Linear-style init U(-1/sqrt(in), 1/sqrt(in)); weights stored as
    [in_features, out_features] (transpose of torch) so the kernel does x @ W."""
    dims = [input_dim] + list(layer_dims) + [n_cls]
    params = []
    for i in range(len(dims) - 1):
        fan_in, fan_out = dims[i], dims[i + 1]
        key, kw, kb = jax.random.split(key, 3)
        bound = 1.0 / math.sqrt(fan_in)
        w = jax.random.uniform(kw, (fan_in, fan_out), jnp.float32, -bound, bound)
        b = jax.random.uniform(kb, (1, fan_out), jnp.float32, -bound, bound)
        params += [w, b]
    return tuple(params)


def pack_params(params, layer_dims, n_cls):
    """One-time packing: zero-pad hidden dims to multiples of 128 (lane-dense
    MXU tiles; numerically exact) and cast weights to bf16; biases stay f32."""
    w1, b1, w2, b2, w3, b3 = params
    h1, h2 = layer_dims
    h1p, h2p = _round_up(h1, 128), _round_up(h2, 128)
    w1p = jnp.pad(w1, ((0, 0), (0, h1p - h1))).astype(jnp.bfloat16)
    b1p = jnp.pad(b1, ((0, 0), (0, h1p - h1)))
    w2p = jnp.pad(w2, ((0, h1p - h1), (0, h2p - h2))).astype(jnp.bfloat16)
    b2p = jnp.pad(b2, ((0, 0), (0, h2p - h2)))
    w3p = jnp.pad(w3, ((0, h2p - h2), (0, 0))).astype(jnp.bfloat16)
    b3p = b3
    return (w1p, b1p, w2p, b2p, w3p, b3p)


if __name__ == "__main__":
    # Small shapes consistent with the module: NCHW input flattened to input_dim.
    B, C, H, W = 2, 4, 16, 16
    input_dim = C * H * W            # 1024
    layer_dims = (300, 100)          # module defaults
    n_cls = 10

    key = jax.random.PRNGKey(0)
    key, kx = jax.random.split(key)
    x = jax.random.normal(kx, (B, C, H, W), dtype=jnp.float32)

    raw_params = init_params(key, input_dim, layer_dims, n_cls)
    packed = pack_params(raw_params, layer_dims, n_cls)

    out = jax.block_until_ready(incoming_noisy_mlp_forward(x, packed))
    assert out.shape == (B, n_cls)

    # Reference 1: same bf16-matmul / f32-accumulate math as the kernel.
    w1p, b1p, w2p, b2p, w3p, b3p = packed
    x2d = x.reshape(B, -1)
    r1 = jnp.maximum(jnp.dot(x2d.astype(jnp.bfloat16), w1p,
                             preferred_element_type=jnp.float32) + b1p, 0.0)
    r2 = jnp.maximum(jnp.dot(r1.astype(jnp.bfloat16), w2p,
                             preferred_element_type=jnp.float32) + b2p, 0.0)
    ref_bf16 = jnp.dot(r2.astype(jnp.bfloat16), w3p,
                       preferred_element_type=jnp.float32) + b3p
    assert jnp.allclose(out, ref_bf16, atol=1e-2, rtol=1e-2)

    # Reference 2: original f32, unpadded semantics (checks padding exactness;
    # residual diff is only bf16 weight/activation rounding).
    w1, b1, w2, b2, w3, b3 = raw_params
    rf = jnp.maximum(x2d @ w1 + b1, 0.0)
    rf = jnp.maximum(rf @ w2 + b2, 0.0)
    ref_f32 = rf @ w3 + b3
    assert jnp.allclose(out, ref_f32, atol=5e-2, rtol=5e-2)

    print("KERNEL_OK")
</pallas_src>

<mosaic_0001>
module attributes {stable_mosaic.version = 11 : i64} {
  func.func @_mlp_kernel(%arg0: i32, %arg1: memref<8x1024xf32, #tpu.memory_space<vmem>>, %arg2: memref<1024x384xbf16, #tpu.memory_space<vmem>>, %arg3: memref<1x384xf32, #tpu.memory_space<vmem>>, %arg4: memref<384x128xbf16, #tpu.memory_space<vmem>>, %arg5: memref<1x128xf32, #tpu.memory_space<vmem>>, %arg6: memref<128x10xbf16, #tpu.memory_space<vmem>>, %arg7: memref<1x10xf32, #tpu.memory_space<vmem>>, %arg8: memref<8x10xf32, #tpu.memory_space<vmem>>, %arg9: memref<8x384xbf16, #tpu.memory_space<vmem>>) attributes {dimension_semantics = [#tpu.dimension_semantics<parallel>], iteration_bounds = array<i64: 1>, scalar_prefetch = 0 : i64, scratch_operands = 1 : i64, tpu.core_type = #tpu.core_type<tc>, window_params = [{transform_indices = @transform_0, window_bounds = array<i64: 8, 1024>}, {pipeline_mode = #tpu.pipeline_mode<synchronous>, transform_indices = @transform_1, window_bounds = array<i64: 1024, 384>}, {pipeline_mode = #tpu.pipeline_mode<synchronous>, transform_indices = @transform_2, window_bounds = array<i64: 1, 384>}, {pipeline_mode = #tpu.pipeline_mode<synchronous>, transform_indices = @transform_3, window_bounds = array<i64: 384, 128>}, {pipeline_mode = #tpu.pipeline_mode<synchronous>, transform_indices = @transform_4, window_bounds = array<i64: 1, 128>}, {pipeline_mode = #tpu.pipeline_mode<synchronous>, transform_indices = @transform_5, window_bounds = array<i64: 128, 10>}, {pipeline_mode = #tpu.pipeline_mode<synchronous>, transform_indices = @transform_6, window_bounds = array<i64: 1, 10>}, {transform_indices = @transform_7, window_bounds = array<i64: 8, 10>}]} {
    %c0 = arith.constant 0 : index
    %c0_0 = arith.constant 0 : index
    %0 = vector.load %arg1[%c0, %c0_0] : memref<8x1024xf32, #tpu.memory_space<vmem>>, vector<8x1024xf32>
    %1 = arith.truncf %0 : vector<8x1024xf32> to vector<8x1024xbf16>
    %c0_1 = arith.constant 0 : index
    %c0_2 = arith.constant 0 : index
    %2 = vector.load %arg2[%c0_1, %c0_2] : memref<1024x384xbf16, #tpu.memory_space<vmem>>, vector<1024x384xbf16>
    %cst = arith.constant dense<0.000000e+00> : vector<8x384xf32>
    %3 = tpu.matmul %1, %2, %cst {dimension_numbers = #tpu.dot_dimension_numbers<[1], [0], [0], [1], [0, 0, 1, 1], [], []>} : vector<8x1024xbf16>, vector<1024x384xbf16>, vector<8x384xf32> -> vector<8x384xf32>
    %c0_3 = arith.constant 0 : index
    %c0_4 = arith.constant 0 : index
    %4 = vector.load %arg3[%c0_3, %c0_4] : memref<1x384xf32, #tpu.memory_space<vmem>>, vector<1x384xf32>
    %5 = vector.broadcast %4 : vector<1x384xf32> to vector<8x384xf32>
    %6 = arith.addf %3, %5 : vector<8x384xf32>
    %cst_5 = arith.constant 0.000000e+00 : f32
    %7 = vector.broadcast %cst_5 : f32 to vector<8x384xf32>
    %8 = arith.maximumf %6, %7 : vector<8x384xf32>
    %9 = arith.truncf %8 : vector<8x384xf32> to vector<8x384xbf16>
    %c0_6 = arith.constant 0 : index
    %c0_7 = arith.constant 0 : index
    %10 = vector.load %arg9[%c0_6, %c0_7] : memref<8x384xbf16, #tpu.memory_space<vmem>>, vector<8x384xbf16>
    tpu.vector_store %arg9[%c0_6, %c0_7], %9 {strides = array<i32>} : memref<8x384xbf16, #tpu.memory_space<vmem>>, vector<8x384xbf16>,
    %c0_8 = arith.constant 0 : index
    %c0_9 = arith.constant 0 : index
    %11 = vector.load %arg9[%c0_8, %c0_9] : memref<8x384xbf16, #tpu.memory_space<vmem>>, vector<8x384xbf16>
    %c0_10 = arith.constant 0 : index
    %c0_11 = arith.constant 0 : index
    %12 = vector.load %arg4[%c0_10, %c0_11] : memref<384x128xbf16, #tpu.memory_space<vmem>>, vector<384x128xbf16>
    %cst_12 = arith.constant dense<0.000000e+00> : vector<8x128xf32>
    %13 = tpu.matmul %11, %12, %cst_12 {dimension_numbers = #tpu.dot_dimension_numbers<[1], [0], [0], [1], [0, 0, 1, 1], [], []>} : vector<8x384xbf16>, vector<384x128xbf16>, vector<8x128xf32> -> vector<8x128xf32>
    %c0_13 = arith.constant 0 : index
    %c0_14 = arith.constant 0 : index
    %14 = vector.load %arg5[%c0_13, %c0_14] : memref<1x128xf32, #tpu.memory_space<vmem>>, vector<1x128xf32>
    %15 = vector.broadcast %14 : vector<1x128xf32> to vector<8x128xf32>
    %16 = arith.addf %13, %15 : vector<8x128xf32>
    %cst_15 = arith.constant 0.000000e+00 : f32
    %17 = vector.broadcast %cst_15 : f32 to vector<8x128xf32>
    %18 = arith.maximumf %16, %17 : vector<8x128xf32>
    %19 = arith.truncf %18 : vector<8x128xf32> to vector<8x128xbf16>
    %c0_16 = arith.constant 0 : index
    %c0_17 = arith.constant 0 : index
    %20 = vector.load %arg6[%c0_16, %c0_17] : memref<128x10xbf16, #tpu.memory_space<vmem>>, vector<128x10xbf16>
    %cst_18 = arith.constant dense<0.000000e+00> : vector<8x10xf32>
    %21 = tpu.matmul %19, %20, %cst_18 {dimension_numbers = #tpu.dot_dimension_numbers<[1], [0], [0], [1], [0, 0, 1, 1], [], []>} : vector<8x128xbf16>, vector<128x10xbf16>, vector<8x10xf32> -> vector<8x10xf32>
    %c0_19 = arith.constant 0 : index
    %c0_20 = arith.constant 0 : index
    %22 = vector.load %arg7[%c0_19, %c0_20] : memref<1x10xf32, #tpu.memory_space<vmem>>, vector<1x10xf32>
    %23 = vector.broadcast %22 : vector<1x10xf32> to vector<8x10xf32>
    %24 = arith.addf %21, %23 : vector<8x10xf32>
    %c0_21 = arith.constant 0 : index
    %c0_22 = arith.constant 0 : index
    %25 = vector.load %arg8[%c0_21, %c0_22] : memref<8x10xf32, #tpu.memory_space<vmem>>, vector<8x10xf32>
    tpu.vector_store %arg8[%c0_21, %c0_22], %24 {strides = array<i32>} : memref<8x10xf32, #tpu.memory_space<vmem>>, vector<8x10xf32>,
    return
  }
  func.func @transform_0(%arg0: i32) -> (i32, i32) {
    %c0_i32 = arith.constant 0 : i32
    %c0_i32_0 = arith.constant 0 : i32
    return %arg0, %c0_i32 : i32, i32
  }
  func.func @transform_1(%arg0: i32) -> (i32, i32) {
    %c0_i32 = arith.constant 0 : i32
    %c0_i32_0 = arith.constant 0 : i32
    %c0_i32_1 = arith.constant 0 : i32
    return %c0_i32, %c0_i32_0 : i32, i32
  }
  func.func @transform_2(%arg0: i32) -> (i32, i32) {
    %c0_i32 = arith.constant 0 : i32
    %c0_i32_0 = arith.constant 0 : i32
    %c0_i32_1 = arith.constant 0 : i32
    return %c0_i32, %c0_i32_0 : i32, i32
  }
  func.func @transform_3(%arg0: i32) -> (i32, i32) {
    %c0_i32 = arith.constant 0 : i32
    %c0_i32_0 = arith.constant 0 : i32
    %c0_i32_1 = arith.constant 0 : i32
    return %c0_i32, %c0_i32_0 : i32, i32
  }
  func.func @transform_4(%arg0: i32) -> (i32, i32) {
    %c0_i32 = arith.constant 0 : i32
    %c0_i32_0 = arith.constant 0 : i32
    %c0_i32_1 = arith.constant 0 : i32
    return %c0_i32, %c0_i32_0 : i32, i32
  }
  func.func @transform_5(%arg0: i32) -> (i32, i32) {
    %c0_i32 = arith.constant 0 : i32
    %c0_i32_0 = arith.constant 0 : i32
    %c0_i32_1 = arith.constant 0 : i32
    return %c0_i32, %c0_i32_0 : i32, i32
  }
  func.func @transform_6(%arg0: i32) -> (i32, i32) {
    %c0_i32 = arith.constant 0 : i32
    %c0_i32_0 = arith.constant 0 : i32
    %c0_i32_1 = arith.constant 0 : i32
    return %c0_i32, %c0_i32_0 : i32, i32
  }
  func.func @transform_7(%arg0: i32) -> (i32, i32) {
    %c0_i32 = arith.constant 0 : i32
    %c0_i32_0 = arith.constant 0 : i32
    return %arg0, %c0_i32 : i32, i32
  }
}

</mosaic_0001>

<bundles_post_ra>
// kernel: tpu_custom_call.1
= control target key start
LH: loop header
LB: loop body
LE: loop exit
PB: predicated region body
PF: predicated region fallthrough
CT: control target
= control target key end

     0   :  { %12 = vsyncpa [#allocation4], 0  ;;  %s3099_s0 = inlined_call_operand.vmem [shape: f32[8,1024], index: 0, kind: input, shape index: {}]   ;;  %s3100_s1 = inlined_call_operand.hbm [shape: bf16[1024,384], index: 1, kind: input, shape index: {}]   ;;  %s3101_s2 = inlined_call_operand.vmem [shape: f32[1,384], index: 2, kind: input, shape index: {}]   ;;  %s3102_s3 = inlined_call_operand.hbm [shape: bf16[384,128], index: 3, kind: input, shape index: {}]   ;;  %s3103_s4 = inlined_call_operand.vmem [shape: f32[1,128], index: 4, kind: input, shape index: {}]   ;;  %s3104_s5 = inlined_call_operand.vmem [shape: bf16[128,10], index: 5, kind: input, shape index: {}]   ;;  %s3105_s6 = inlined_call_operand.vmem [shape: f32[1,10], index: 6, kind: input, shape index: {}]   ;;  %s3106_s7 = inlined_call_operand.hbm [shape: f32[8,10], index: 7, kind: output, shape index: {}]  }
   0x1   :  { %13 = vsyncpa [#allocation7], 0 }
   0x2   :  { %14 = vsyncpa [#allocation5], 0  ;;  %s2921_s24 = smov [#allocation3]   ;;  %s2849_s28 = scalar_lea.hbm %s3100_s1, 24576 }
   0x3   :  { %s22_s25 = sshll.u32 %s2921_s24, 4  ;;  %p2850_p0 = scmp.ne.s32.totalorder %s3100_s1, %s2849_s28  ;;  %s23_s25 = int_to_ptr.vmem [resolvable:$true] %s22_s25 }
   0x4   :  { %p2853_p1 = scmp.lt.u32.totalorder %s2849_s28, %s3100_s1 }
   0x6   :  { %p2855_p2 = pnand %p2853_p1, %p2850_p0 }
   0x8   :  { %2858 = shalt.err (!%p2855_p2)
}
   0x9   :  { %s2859_s10 = scalar_lea.vmem %s23_s25, 24576  ;;  %p2864_p4 = scmp.lt.s32.totalorder %s23_s25, %s23_s25 }
   0xa   :  { %p2860_p3 = scmp.ne.s32.totalorder %s23_s25, %s2859_s10  ;;  %p2865_p5 = scmp.lt.s32.totalorder %s2859_s10, %s2859_s10 }
   0xc   :  { %p2866_p6 = por %p2865_p5, %p2864_p4 }
   0xe   :  { %p2867_p7 = pnand %p2866_p6, %p2860_p3 }
  0x10   :  { %2870 = shalt.err (!%p2867_p7)
}
  0x11   :  { %s2922_s11 = smov 192   ;;  %s2923_s12 = smov 12  }
  0x12   :  { %28 = dma.hbm_to_vmem [thread:$0]  %s3100_s1, 24576, %s23_s25, [#allocation4], %s2922_s11, %s2922_s11, %s2923_s12  }
  0x13   :  { %s2924_s15 = smov [#allocation6]   ;;  %s2871_s19 = scalar_lea.hbm %s3102_s3, 3072 }
  0x14   :  { %s36_s16 = sshll.u32 %s2924_s15, 4  ;;  %p2872_p8 = scmp.ne.s32.totalorder %s3102_s3, %s2871_s19  ;;  %s37_s16 = int_to_ptr.vmem [resolvable:$true] %s36_s16 }
  0x15   :  { %p2875_p9 = scmp.lt.u32.totalorder %s2871_s19, %s3102_s3 }
  0x17   :  { %p2877_p10 = pnand %p2875_p9, %p2872_p8 }
  0x19   :  { %2880 = shalt.err (!%p2877_p10)
}
  0x1a   :  { %s2881_s24 = scalar_lea.vmem %s37_s16, 3072  ;;  %p2886_p12 = scmp.lt.s32.totalorder %s37_s16, %s37_s16 }
  0x1b   :  { %p2882_p11 = scmp.ne.s32.totalorder %s37_s16, %s2881_s24  ;;  %p2887_p13 = scmp.lt.s32.totalorder %s2881_s24, %s2881_s24 }
  0x1d   :  { %p2888_p0 = por %p2887_p13, %p2886_p12 }
  0x1f   :  { %p2889_p1 = pnand %p2888_p0, %p2882_p11 }
  0x21   :  { %2892 = shalt.err (!%p2889_p1)
}
  0x22   :  { %s2925_s1 = smov 64   ;;  %s2926_s25 = smov 4  }
  0x23   :  { %42 = dma.hbm_to_vmem [thread:$0]  %s3102_s3, 3072, %s37_s16, [#allocation7], %s2925_s1, %s2925_s1, %s2926_s25  }
  0x24   :  { %2915 = dma.done.wait [#allocation4], 24576  }
  0x25   :  { %2916 = vsyncadd [#allocation4], 4294942720 }
  0x26   :  { %2917 = dma.done.wait [#allocation7], 3072  }
  0x27   :  { %2918 = vsyncadd [#allocation7], 4294964224  ;;  %v2558_v0 = vld [vmem:[#allocation3 + $0x4] ss:$12 sps:$4 sm:$0xff]   ;;  %v2560_v1 = vld [vmem:[#allocation3] ss:$12 sps:$4 sm:$0xff]  }
  0x28   :  { %1369 = vmatprep.subr.bf16.mxu0 %v2558_v0  ;;  %v2561_v2 = vld [vmem:[#allocation3 + $0x1c] ss:$12 sps:$4 sm:$0xff]   ;;  %v2563_v3 = vld [vmem:[#allocation3 + $0x18] ss:$12 sps:$4 sm:$0xff]   ;;  %v2564_v4 = vld [vmem:[#allocation3 + $0x34] ss:$12 sps:$4 sm:$0xff]  }
  0x29   :  { %1370 = vmatpush1.bf16.msra.mxu0 %v2560_v1  ;;  %v2566_v5 = vld [vmem:[#allocation3 + $0x30] ss:$12 sps:$4 sm:$0xff]   ;;  %v2567_v6 = vld [vmem:[#allocation3 + $0x4c] ss:$12 sps:$4 sm:$0xff]   ;;  %v2569_v7 = vld [vmem:[#allocation3 + $0x48] ss:$12 sps:$4 sm:$0xff]  }
  0x2a   :  { %1371 = vmatprep.subr.bf16.mxu0 %v2561_v2  ;;  %v2570_v8 = vld [vmem:[#allocation3 + $0x64] ss:$12 sps:$4 sm:$0xff]   ;;  %v2572_v9 = vld [vmem:[#allocation3 + $0x60] ss:$12 sps:$4 sm:$0xff]   ;;  %v2573_v10 = vld [vmem:[#allocation3 + $0x7c] ss:$12 sps:$4 sm:$0xff]  }
  0x2b   :  { %v2575_v11 = vld [vmem:[#allocation3 + $0x78] ss:$12 sps:$4 sm:$0xff]   ;;  %v2576_v12 = vld [vmem:[#allocation3 + $0x94] ss:$12 sps:$4 sm:$0xff]   ;;  %v2578_v15 = vld [vmem:[#allocation3 + $0x90] ss:$12 sps:$4 sm:$0xff]  }
  0x2c   :  { %v57_v13 = vld [vmem:[%s3099_s0 + $0x8] sm:$0xff]  ;;  %v2579_v16 = vld [vmem:[#allocation3 + $0xac] ss:$12 sps:$4 sm:$0xff]   ;;  %v2612_v17 = vld [vmem:[#allocation3 + $0xc8] ss:$12 sps:$4 sm:$0xff]   ;;  %vm2928_vm0 = vmmov 0  }
  0x2d   :  { %1372 = vmatpush1.bf16.msra.mxu0 %v2563_v3  ;;  %v65_v14 = vpack.c.bf16 %v57_v13, %v57_v13  ;;  %v2613_v18 = vld [vmem:[#allocation3 + $0x8] ss:$12 sps:$4 sm:$0xff]   ;;  %v2582_v20 = vld [vmem:[#allocation3 + $0xc4] ss:$12 sps:$4 sm:$0xff]   ;;  %2367 = vmatprep.subr.bf16.mxu1 %v2612_v17  ;;  %v2617_v21 = vld [vmem:[#allocation3 + $0xe0] ss:$12 sps:$4 sm:$0xff]  }
  0x2e   :  { %1373 = vmatprep.subr.bf16.mxu0 %v2564_v4  ;;  %v2581_v19 = vld [vmem:[#allocation3 + $0xa8] ss:$12 sps:$4 sm:$0xff]   ;;  %2368 = vmatpush3.bf16.msra.mxu1 %v2613_v18  ;;  %v2618_v22 = vld [vmem:[#allocation3 + $0x20] ss:$12 sps:$4 sm:$0xff]   ;;  %v2622_v25 = vld [vmem:[#allocation3 + $0xf8] ss:$12 sps:$4 sm:$0xff]  }
  0x2f   :  { %1401 = vmatprep.mubr.bf16.mxu0 %v65_v14  ;;  %1565 = vmatprep.mubr.bf16.mxu1 %v65_v14  ;;  %v2584_v23 = vld [vmem:[#allocation3 + $0xc0] ss:$12 sps:$4 sm:$0xff]   ;;  %v2585_v24 = vld [vmem:[#allocation3 + $0xdc] ss:$12 sps:$4 sm:$0xff]   ;;  %v2623_v26 = vld [vmem:[#allocation3 + $0x38] ss:$12 sps:$4 sm:$0xff]  }
  0x30   :  { %2369 = vmatprep.subr.bf16.mxu1 %v2617_v21  ;;  %v2587_v27 = vld [vmem:[#allocation3 + $0xd8] ss:$12 sps:$4 sm:$0xff]   ;;  %v2588_v28 = vld [vmem:[#allocation3 + $0xf4] ss:$12 sps:$4 sm:$0xff]   ;;  %v2627_v29 = vld [vmem:[#allocation3 + $0x110] ss:$12 sps:$4 sm:$0xff]  }
  0x31   :  { %1374 = vmatpush1.bf16.msra.mxu0 %v2566_v5  ;;  %v2628_v30 = vld [vmem:[#allocation3 + $0x50] ss:$12 sps:$4 sm:$0xff]   ;;  %v2632_v32 = vld [vmem:[#allocation3 + $0x128] ss:$12 sps:$4 sm:$0xff]   ;;  %v2591_v33 = vld [vmem:[#allocation3 + $0x10c] ss:$12 sps:$4 sm:$0xff]  }
  0x32   :  { %1375 = vmatprep.subr.bf16.mxu0 %v2567_v6  ;;  %2370 = vmatpush3.bf16.msra.mxu1 %v2618_v22  ;;  %v2590_v31 = vld [vmem:[#allocation3 + $0xf0] ss:$12 sps:$4 sm:$0xff]   ;;  %v2633_v34 = vld [vmem:[#allocation3 + $0x68] ss:$12 sps:$4 sm:$0xff]   ;;  %v2637_v35 = vld [vmem:[#allocation3 + $0x140] ss:$12 sps:$4 sm:$0xff]  }
  0x33   :  { %2371 = vmatprep.subr.bf16.mxu1 %v2622_v25  ;;  %v2593_v36 = vld [vmem:[#allocation3 + $0x108] ss:$12 sps:$4 sm:$0xff]   ;;  %v2594_v37 = vld [vmem:[#allocation3 + $0x124] ss:$12 sps:$4 sm:$0xff]   ;;  %v2638_v38 = vld [vmem:[#allocation3 + $0x80] ss:$12 sps:$4 sm:$0xff]  }
  0x34   :  { %v2642_v39 = vld [vmem:[#allocation3 + $0x158] ss:$12 sps:$4 sm:$0xff]   ;;  %v2596_v40 = vld [vmem:[#allocation3 + $0x120] ss:$12 sps:$4 sm:$0xff]   ;;  %v2597_v41 = vld [vmem:[#allocation3 + $0x13c] ss:$12 sps:$4 sm:$0xff]  }
  0x35   :  { %1376 = vmatpush1.bf16.msra.mxu0 %v2569_v7  ;;  %v2643_v42 = vld [vmem:[#allocation3 + $0x98] ss:$12 sps:$4 sm:$0xff]   ;;  %v2647_v43 = vld [vmem:[#allocation3 + $0x170] ss:$12 sps:$4 sm:$0xff]   ;;  %v2600_v45 = vld [vmem:[#allocation3 + $0x154] ss:$12 sps:$4 sm:$0xff]  }
  0x36   :  { %1377 = vmatprep.subr.bf16.mxu0 %v2570_v8  ;;  %2372 = vmatpush3.bf16.msra.mxu1 %v2623_v26  ;;  %v2599_v44 = vld [vmem:[#allocation3 + $0x138] ss:$12 sps:$4 sm:$0xff]   ;;  %v2648_v46 = vld [vmem:[#allocation3 + $0xb0] ss:$12 sps:$4 sm:$0xff]   ;;  %v2652_v47 = vld [vmem:[#allocation3 + $0x248] ss:$12 sps:$4 sm:$0xff]  }
  0x37   :  { %2373 = vmatprep.subr.bf16.mxu1 %v2627_v29  ;;  %v2602_v48 = vld [vmem:[#allocation3 + $0x150] ss:$12 sps:$4 sm:$0xff]   ;;  %v56_v49 = vld [vmem:[%s3099_s0] sm:$0xff]  ;;  %v2657_v53 = vld [vmem:[#allocation3 + $0x260] ss:$12 sps:$4 sm:$0xff]   ;;  %s2929_s14 = smov [#allocation8]  }
  0x38   :  { %v2603_v50 = vld [vmem:[#allocation3 + $0x16c] ss:$12 sps:$4 sm:$0xff]   ;;  %v2653_v51 = vld [vmem:[#allocation3 + $0x188] ss:$12 sps:$4 sm:$0xff]   ;;  %v64_v52 = vpack.c.bf16 %v56_v49, %v56_v49  ;;  %v2608_v55 = vld [vmem:[#allocation3 + $0x184] ss:$12 sps:$4 sm:$0xff]  }
  0x39   :  { %1378 = vmatpush1.bf16.msra.mxu0 %v2572_v9  ;;  %v2605_v54 = vld [vmem:[#allocation3 + $0x168] ss:$12 sps:$4 sm:$0xff]   ;;  %v2658_v56 = vld [vmem:[#allocation3 + $0x1a0] ss:$12 sps:$4 sm:$0xff]   ;;  %v2662_v57 = vld [vmem:[#allocation3 + $0x278] ss:$12 sps:$4 sm:$0xff]  }
  0x3a   :  { %1379 = vmatprep.subr.bf16.mxu0 %v2573_v10  ;;  %2374 = vmatpush3.bf16.msra.mxu1 %v2628_v30  ;;  %v2606_v58 = vld [vmem:[#allocation3 + $0x180] ss:$12 sps:$4 sm:$0xff]   ;;  %v2611_v59 = vld [vmem:[#allocation3 + $0x19c] ss:$12 sps:$4 sm:$0xff]   ;;  %v2663_v60 = vld [vmem:[#allocation3 + $0x1b8] ss:$12 sps:$4 sm:$0xff]  }
  0x3b   :  { %2375 = vmatprep.subr.bf16.mxu1 %v2632_v32  ;;  %v2667_v61 = vld [vmem:[#allocation3 + $0x290] ss:$12 sps:$4 sm:$0xff]   ;;  %v2609_v62 = vld [vmem:[#allocation3 + $0x198] ss:$12 sps:$4 sm:$0xff]   ;;  %v2616_v63 = vld [vmem:[#allocation3 + $0x1b4] ss:$12 sps:$4 sm:$0xff]  }
  0x3c   :  { %v2668_v0 = vld [vmem:[#allocation3 + $0x1d0] ss:$12 sps:$4 sm:$0xff]   ;;  %v2672_v1 = vld [vmem:[#allocation3 + $0x2a8] ss:$12 sps:$4 sm:$0xff]   ;;  %v2621_v3 = vld [vmem:[#allocation3 + $0x1cc] ss:$12 sps:$4 sm:$0xff]  }
  0x3d   :  { %1380 = vmatpush1.bf16.msra.mxu0 %v2575_v11  ;;  %v2614_v2 = vld [vmem:[#allocation3 + $0x1b0] ss:$12 sps:$4 sm:$0xff]   ;;  %v2673_v4 = vld [vmem:[#allocation3 + $0x1e8] ss:$12 sps:$4 sm:$0xff]   ;;  %v2677_v5 = vld [vmem:[#allocation3 + $0x2c0] ss:$12 sps:$4 sm:$0xff]  }
  0x3e   :  { %1381 = vmatprep.subr.bf16.mxu0 %v2576_v12  ;;  %2376 = vmatpush3.bf16.msra.mxu1 %v2633_v34  ;;  %v59_v6 = vld [vmem:[%s3099_s0 + $0x18] sm:$0xff]  ;;  %v2619_v7 = vld [vmem:[#allocation3 + $0x1c8] ss:$12 sps:$4 sm:$0xff]   ;;  %v2682_v11 = vld [vmem:[#allocation3 + $0x2d8] ss:$12 sps:$4 sm:$0xff]   ;;  %s2124_s15 = sshll.u32 %s2929_s14, 4  ;;  %s2125_s15 = int_to_ptr.vmem [resolvable:$true] %s2124_s15 }
  0x3f   :  { %2377 = vmatprep.subr.bf16.mxu1 %v2637_v35  ;;  %v67_v8 = vpack.c.bf16 %v59_v6, %v59_v6  ;;  %v2626_v9 = vld [vmem:[#allocation3 + $0x1e4] ss:$12 sps:$4 sm:$0xff]   ;;  %v2678_v10 = vld [vmem:[#allocation3 + $0x200] ss:$12 sps:$4 sm:$0xff]   ;;  %v2631_v13 = vld [vmem:[#allocation3 + $0x1fc] ss:$12 sps:$4 sm:$0xff]   ;;  %p2898_p3 = scmp.lt.s32.totalorder %s2125_s15, %s2125_s15 }
  0x40   :  { %v2624_v12 = vld [vmem:[#allocation3 + $0x1e0] ss:$12 sps:$4 sm:$0xff]   ;;  %v2683_v14 = vld [vmem:[#allocation3 + $0x218] ss:$12 sps:$4 sm:$0xff]   ;;  %v2634_v21 = vld [vmem:[#allocation3 + $0x210] ss:$12 sps:$4 sm:$0xff]  }
  0x41   :  { %1382 = vmatpush1.bf16.msra.mxu0 %v2578_v15  ;;  %v2629_v15 = vld [vmem:[#allocation3 + $0x1f8] ss:$12 sps:$4 sm:$0xff]   ;;  %v2636_v17 = vld [vmem:[#allocation3 + $0x214] ss:$12 sps:$4 sm:$0xff]   ;;  %v2671_v49 = vld [vmem:[#allocation3 + $0x2bc] ss:$12 sps:$4 sm:$0xff]  }
  0x42   :  { %1383 = vmatprep.subr.bf16.mxu0 %v2579_v16  ;;  %2378 = vmatpush3.bf16.msra.mxu1 %v2638_v38  ;;  %v2687_v16 = vld [vmem:[#allocation3 + $0x2f0] ss:$12 sps:$4 sm:$0xff]   ;;  %v58_v18 = vld [vmem:[%s3099_s0 + $0x10] sm:$0xff]  ;;  %v2697_v25 = vld [vmem:[#allocation3 + $0x3e0] ss:$12 sps:$4 sm:$0xff]   ;;  %vm2116_vm1 = vcmask 80896  }
  0x43   :  { %2379 = vmatprep.subr.bf16.mxu1 %v2642_v39  ;;  %v3006_v22 = vpack.c.bf16 %v58_v18, %v58_v18  ;;  %v2639_v26 = vld [vmem:[#allocation3 + $0x228] ss:$12 sps:$4 sm:$0xff]   ;;  %v2702_v29 = vld [vmem:[#allocation3 + $0x3f8] ss:$12 sps:$4 sm:$0xff]   ;;  %v2644_v30 = vld [vmem:[#allocation3 + $0x240] ss:$12 sps:$4 sm:$0xff]  }
  0x44   :  { %v2703_v32 = vld [vmem:[#allocation3 + $0x338] ss:$12 sps:$4 sm:$0xff]   ;;  %v2656_v35 = vld [vmem:[#allocation3 + $0x274] ss:$12 sps:$4 sm:$0xff]   ;;  %v2654_v38 = vld [vmem:[#allocation3 + $0x270] ss:$12 sps:$4 sm:$0xff]  }
  0x45   :  { %1384 = vmatpush1.bf16.msra.mxu0 %v2581_v19  ;;  %v2688_v19 = vld [vmem:[#allocation3 + $0x230] ss:$12 sps:$4 sm:$0xff]   ;;  %v2649_v34 = vld [vmem:[#allocation3 + $0x258] ss:$12 sps:$4 sm:$0xff]   ;;  %v2758_v18 = vld [vmem:[#allocation3 + $0x500] ss:$12 sps:$4 sm:$0xff]  }
  0x46   :  { %1385 = vmatprep.subr.bf16.mxu0 %v2582_v20  ;;  %2380 = vmatpush3.bf16.msra.mxu1 %v2643_v42  ;;  %v2692_v20 = vld [vmem:[#allocation3 + $0x3c8] ss:$12 sps:$4 sm:$0xff]   ;;  %v2661_v39 = vld [vmem:[#allocation3 + $0x28c] ss:$12 sps:$4 sm:$0xff]   ;;  %v61_v42 = vld [vmem:[%s3099_s0 + $0x28] sm:$0xff] }
  0x47   :  { %2381 = vmatprep.subr.bf16.mxu1 %v2647_v43  ;;  %v2659_v43 = vld [vmem:[#allocation3 + $0x288] ss:$12 sps:$4 sm:$0xff]   ;;  %v2689_v6 = vld [vmem:[#allocation3 + $0x318] ss:$12 sps:$4 sm:$0xff]  }
  0x49   :  { %1386 = vmatpush1.bf16.msra.mxu0 %v2584_v23  ;;  %v2641_v23 = vld [vmem:[#allocation3 + $0x22c] ss:$12 sps:$4 sm:$0xff]  }
  0x4a   :  { %1387 = vmatprep.subr.bf16.mxu0 %v2585_v24  ;;  %2382 = vmatpush3.bf16.msra.mxu1 %v2648_v46  ;;  %v2693_v24 = vld [vmem:[#allocation3 + $0x308] ss:$12 sps:$4 sm:$0xff]   ;;  %v2718_v46 = vld [vmem:[#allocation3 + $0x380] ss:$12 sps:$4 sm:$0xff]  }
  0x4b   :  { %2389 = vmatprep.subr.bf16.mxu1 %v2652_v47  ;;  %v2722_v47 = vld [vmem:[#allocation3 + $0x458] ss:$12 sps:$4 sm:$0xff]  }
  0x4d   :  { %1388 = vmatpush1.bf16.msra.mxu0 %v2587_v27  ;;  %1566 = vmatmul.mubr.bf16.vlgmr.msra.gmra.mrb[0].mxu1 %v64_v52  ;;  %v2646_v27 = vld [vmem:[#allocation3 + $0x244] ss:$12 sps:$4 sm:$0xff]  }
  0x4e   :  { %1389 = vmatprep.subr.bf16.mxu0 %v2588_v28  ;;  %2390 = vmatpush3.bf16.msra.mxu1 %v2653_v51  ;;  %v2698_v28 = vld [vmem:[#allocation3 + $0x320] ss:$12 sps:$4 sm:$0xff]   ;;  %v2727_v51 = vld [vmem:[#allocation3 + $0x470] ss:$12 sps:$4 sm:$0xff]  }
  0x4f   :  { %2391 = vmatprep.subr.bf16.mxu1 %v2657_v53  ;;  %1605 = vmatprep.mubr.bf16.mxu1 %v67_v8  ;;  %v2676_v53 = vld [vmem:[#allocation3 + $0x2d4] ss:$12 sps:$4 sm:$0xff]  }
  0x51   :  { %1390 = vmatpush1.bf16.msra.mxu0 %v2590_v31  ;;  %v2651_v31 = vld [vmem:[#allocation3 + $0x25c] ss:$12 sps:$4 sm:$0xff]  }
  0x52   :  { %1391 = vmatprep.subr.bf16.mxu0 %v2591_v33  ;;  %2392 = vmatpush3.bf16.msra.mxu1 %v2658_v56  ;;  %v2707_v33 = vld [vmem:[#allocation3 + $0x410] ss:$12 sps:$4 sm:$0xff]   ;;  %v2732_v56 = vld [vmem:[#allocation3 + $0x548] ss:$12 sps:$4 sm:$0xff]  }
  0x53   :  { %2393 = vmatprep.subr.bf16.mxu1 %v2662_v57  ;;  %v2674_v57 = vld [vmem:[#allocation3 + $0x2d0] ss:$12 sps:$4 sm:$0xff]  }
  0x55   :  { %1392 = vmatpush1.bf16.msra.mxu0 %v2593_v36  ;;  %v2708_v36 = vld [vmem:[#allocation3 + $0x350] ss:$12 sps:$4 sm:$0xff]  }
  0x56   :  { %1393 = vmatprep.subr.bf16.mxu0 %v2594_v37  ;;  %2394 = vmatpush3.bf16.msra.mxu1 %v2663_v60  ;;  %v2712_v37 = vld [vmem:[#allocation3 + $0x428] ss:$12 sps:$4 sm:$0xff]  }
  0x57   :  { %2395 = vmatprep.subr.bf16.mxu1 %v2667_v61  ;;  %v2733_v60 = vld [vmem:[#allocation3 + $0x488] ss:$12 sps:$4 sm:$0xff]   ;;  %v2737_v61 = vld [vmem:[#allocation3 + $0x560] ss:$12 sps:$4 sm:$0xff]  }
  0x59   :  { %1394 = vmatpush1.bf16.msra.mxu0 %v2596_v40  ;;  %v2713_v40 = vld [vmem:[#allocation3 + $0x368] ss:$12 sps:$4 sm:$0xff]  }
  0x5a   :  { %1395 = vmatprep.subr.bf16.mxu0 %v2597_v41  ;;  %2396 = vmatpush3.bf16.msra.mxu1 %v2668_v0  ;;  %v2717_v41 = vld [vmem:[#allocation3 + $0x440] ss:$12 sps:$4 sm:$0xff]  }
  0x5b   :  { %2397 = vmatprep.subr.bf16.mxu1 %v2672_v1  ;;  %v2738_v0 = vld [vmem:[#allocation3 + $0x4a0] ss:$12 sps:$4 sm:$0xff]   ;;  %v2742_v1 = vld [vmem:[#allocation3 + $0x578] ss:$12 sps:$4 sm:$0xff]  }
  0x5d   :  { %1396 = vmatpush1.bf16.msra.mxu0 %v2599_v44  ;;  %v69_v44 = vpack.c.bf16 %v61_v42, %v61_v42  ;;  %v2751_v42 = vld [vmem:[#allocation3 + $0x43c] ss:$12 sps:$4 sm:$0xff]  }
  0x5e   :  { %1397 = vmatprep.subr.bf16.mxu0 %v2600_v45  ;;  %2398 = vmatpush3.bf16.msra.mxu1 %v2673_v4  ;;  %v2666_v45 = vld [vmem:[#allocation3 + $0x2a4] ss:$12 sps:$4 sm:$0xff]  }
  0x5f   :  { %2399 = vmatprep.subr.bf16.mxu1 %v2677_v5  ;;  %v2743_v4 = vld [vmem:[#allocation3 + $0x4b8] ss:$12 sps:$4 sm:$0xff]   ;;  %v2747_v5 = vld [vmem:[#allocation3 + $0x590] ss:$12 sps:$4 sm:$0xff]  }
  0x61   :  { %1398 = vmatpush1.bf16.msra.mxu0 %v2602_v48  ;;  %v2664_v48 = vld [vmem:[#allocation3 + $0x2a0] ss:$12 sps:$4 sm:$0xff]  }
  0x62   :  { %1399 = vmatprep.subr.bf16.mxu0 %v2603_v50  ;;  %2400 = vmatpush3.bf16.msra.mxu1 %v2678_v10  ;;  %v2723_v50 = vld [vmem:[#allocation3 + $0x398] ss:$12 sps:$4 sm:$0xff]  }
  0x63   :  { %2401 = vmatprep.subr.bf16.mxu1 %v2682_v11  ;;  %v2752_v11 = vld [vmem:[#allocation3 + $0x5a8] ss:$12 sps:$4 sm:$0xff]  }
  0x65   :  { %1400 = vmatpush1.bf16.msra.mxu0 %v2605_v54  ;;  %v2728_v54 = vld [vmem:[#allocation3 + $0x3b0] ss:$12 sps:$4 sm:$0xff]  }
  0x66   :  { %1410 = vmatprep.subr.bf16.mxu0 %v2608_v55  ;;  %2402 = vmatpush3.bf16.msra.mxu1 %v2683_v14  ;;  %v60_v55 = vld [vmem:[%s3099_s0 + $0x20] sm:$0xff] }
  0x67   :  { %2403 = vmatprep.subr.bf16.mxu1 %v2687_v16  ;;  %v2753_v14 = vld [vmem:[#allocation3 + $0x4e8] ss:$12 sps:$4 sm:$0xff]  }
  0x68   :  { %1402 = vmatmul.mubr.bf16.vlgmr.msra.gmra.mrb[0].mxu0 %v64_v52  ;;  %v2669_v52 = vld [vmem:[#allocation3 + $0x2b8] ss:$12 sps:$4 sm:$0xff]   ;;  %v2699_v16 = vld [vmem:[#allocation3 + $0x348] ss:$12 sps:$4 sm:$0xff]  }
  0x69   :  { %1411 = vmatpush1.bf16.msra.mxu0 %v2606_v58  ;;  %1442 = vmatprep.mubr.bf16.mxu0 %v67_v8  ;;  %v2681_v58 = vld [vmem:[#allocation3 + $0x2ec] ss:$12 sps:$4 sm:$0xff]   ;;  %v2696_v8 = vld [vmem:[#allocation3 + $0x334] ss:$12 sps:$4 sm:$0xff]  }
  0x6a   :  { %1412 = vmatprep.subr.bf16.mxu0 %v2611_v59  ;;  %2404 = vmatpush3.bf16.msra.mxu1 %v2688_v19  ;;  %v3015_v59 = vpack.c.bf16 %v60_v55, %v60_v55  ;;  %v2762_v19 = vld [vmem:[#allocation3 + $0x5d8] ss:$12 sps:$4 sm:$0xff]   ;;  %v2775_v55 = vld [vmem:[#allocation3 + $0x4c8] ss:$12 sps:$4 sm:$0xff]  }
  0x6b   :  { %2411 = vmatprep.subr.bf16.mxu1 %v2692_v20  ;;  %v2704_v20 = vld [vmem:[#allocation3 + $0x360] ss:$12 sps:$4 sm:$0xff]  }
  0x6d   :  { %1413 = vmatpush1.bf16.msra.mxu0 %v2609_v62  ;;  %1606 = vmatmul.mubr.bf16.vlgmr.msra.gmra.mrb[4].mxu1 %v3006_v22  ;;  %v2679_v62 = vld [vmem:[#allocation3 + $0x2e8] ss:$12 sps:$4 sm:$0xff]  }
  0x6e   :  { %1414 = vmatprep.subr.bf16.mxu0 %v2616_v63  ;;  %2412 = vmatpush3.bf16.msra.mxu1 %v2693_v24  ;;  %v2686_v63 = vld [vmem:[#allocation3 + $0x304] ss:$12 sps:$4 sm:$0xff]  }
  0x6f   :  { %2413 = vmatprep.subr.bf16.mxu1 %v2697_v25  ;;  %1645 = vmatprep.mubr.bf16.mxu1 %v69_v44  ;;  %v2709_v24 = vld [vmem:[#allocation3 + $0x378] ss:$12 sps:$4 sm:$0xff]   ;;  %v2716_v25 = vld [vmem:[#allocation3 + $0x394] ss:$12 sps:$4 sm:$0xff]  }
  0x71   :  { %1415 = vmatpush1.bf16.msra.mxu0 %v2614_v2  ;;  %v2684_v2 = vld [vmem:[#allocation3 + $0x300] ss:$12 sps:$4 sm:$0xff]  }
  0x72   :  { %1416 = vmatprep.subr.bf16.mxu0 %v2621_v3  ;;  %2414 = vmatpush3.bf16.msra.mxu1 %v2698_v28  ;;  %v2691_v3 = vld [vmem:[#allocation3 + $0x31c] ss:$12 sps:$4 sm:$0xff]  }
  0x73   :  { %2415 = vmatprep.subr.bf16.mxu1 %v2702_v29  ;;  %v2714_v28 = vld [vmem:[#allocation3 + $0x390] ss:$12 sps:$4 sm:$0xff]  }
  0x75   :  { %1417 = vmatpush1.bf16.msra.mxu0 %v2619_v7  ;;  %v63_v7 = vld [vmem:[%s3099_s0 + $0x38] sm:$0xff] }
  0x76   :  { %1418 = vmatprep.subr.bf16.mxu0 %v2626_v9  ;;  %2416 = vmatpush3.bf16.msra.mxu1 %v2703_v32  ;;  %v2748_v9 = vld [vmem:[#allocation3 + $0x4d0] ss:$12 sps:$4 sm:$0xff]   ;;  %v3022_v10 = vpack.c.bf16 %v63_v7, %v63_v7  ;;  %v2799_v7 = vld [vmem:[#allocation3 + $0x588] ss:$12 sps:$4 sm:$0xff]  }
  0x77   :  { %2417 = vmatprep.subr.bf16.mxu1 %v2707_v33  ;;  %v2726_v32 = vld [vmem:[#allocation3 + $0x3c4] ss:$12 sps:$4 sm:$0xff]   ;;  %v2724_v33 = vld [vmem:[#allocation3 + $0x3c0] ss:$12 sps:$4 sm:$0xff]  }
  0x79   :  { %1419 = vmatpush1.bf16.msra.mxu0 %v2624_v12  ;;  %v2694_v12 = vld [vmem:[#allocation3 + $0x330] ss:$12 sps:$4 sm:$0xff]  }
  0x7a   :  { %1420 = vmatprep.subr.bf16.mxu0 %v2631_v13  ;;  %2418 = vmatpush3.bf16.msra.mxu1 %v2708_v36  ;;  %v2701_v13 = vld [vmem:[#allocation3 + $0x34c] ss:$12 sps:$4 sm:$0xff]   ;;  %v2736_v36 = vld [vmem:[#allocation3 + $0x3f4] ss:$12 sps:$4 sm:$0xff]  }
  0x7b   :  { %2419 = vmatprep.subr.bf16.mxu1 %v2712_v37  ;;  %v2734_v37 = vld [vmem:[#allocation3 + $0x3f0] ss:$12 sps:$4 sm:$0xff]  }
  0x7d   :  { %1421 = vmatpush1.bf16.msra.mxu0 %v2629_v15  ;;  %v2757_v15 = vld [vmem:[#allocation3 + $0x5c0] ss:$12 sps:$4 sm:$0xff]  }
  0x7e   :  { %1422 = vmatprep.subr.bf16.mxu0 %v2636_v17  ;;  %2420 = vmatpush3.bf16.msra.mxu1 %v2713_v40  ;;  %v2706_v17 = vld [vmem:[#allocation3 + $0x364] ss:$12 sps:$4 sm:$0xff]  }
  0x7f   :  { %2421 = vmatprep.subr.bf16.mxu1 %v2717_v41  ;;  %v2746_v40 = vld [vmem:[#allocation3 + $0x424] ss:$12 sps:$4 sm:$0xff]   ;;  %v2744_v41 = vld [vmem:[#allocation3 + $0x420] ss:$12 sps:$4 sm:$0xff]  }
  0x81   :  { %1423 = vmatpush1.bf16.msra.mxu0 %v2634_v21  ;;  %v2711_v21 = vld [vmem:[#allocation3 + $0x37c] ss:$12 sps:$4 sm:$0xff]  }
  0x82   :  { %1424 = vmatprep.subr.bf16.mxu0 %v2641_v23  ;;  %2422 = vmatpush3.bf16.msra.mxu1 %v2718_v46  ;;  %v2767_v23 = vld [vmem:[#allocation3 + $0x5f0] ss:$12 sps:$4 sm:$0xff]   ;;  %v2761_v46 = vld [vmem:[#allocation3 + $0x46c] ss:$12 sps:$4 sm:$0xff]  }
  0x83   :  { %2423 = vmatprep.subr.bf16.mxu1 %v2722_v47  ;;  %v2759_v47 = vld [vmem:[#allocation3 + $0x468] ss:$12 sps:$4 sm:$0xff]  }
  0x85   :  { %1425 = vmatpush1.bf16.msra.mxu0 %v2639_v26  ;;  %v2768_v26 = vld [vmem:[#allocation3 + $0x530] ss:$12 sps:$4 sm:$0xff]  }
  0x86   :  { %1426 = vmatprep.subr.bf16.mxu0 %v2646_v27  ;;  %2424 = vmatpush3.bf16.msra.mxu1 %v2723_v50  ;;  %v62_v27 = vld [vmem:[%s3099_s0 + $0x30] sm:$0xff] }
  0x87   :  { %2425 = vmatprep.subr.bf16.mxu1 %v2727_v51  ;;  %v3028_v29 = vpack.c.bf16 %v62_v27, %v62_v27  ;;  %v2771_v50 = vld [vmem:[#allocation3 + $0x49c] ss:$12 sps:$4 sm:$0xff]   ;;  %v2769_v51 = vld [vmem:[#allocation3 + $0x498] ss:$12 sps:$4 sm:$0xff]  }
  0x89   :  { %1427 = vmatpush1.bf16.msra.mxu0 %v2644_v30  ;;  %v2721_v30 = vld [vmem:[#allocation3 + $0x3ac] ss:$12 sps:$4 sm:$0xff]  }
  0x8a   :  { %1428 = vmatprep.subr.bf16.mxu0 %v2651_v31  ;;  %2426 = vmatpush3.bf16.msra.mxu1 %v2728_v54  ;;  %v2719_v31 = vld [vmem:[#allocation3 + $0x3a8] ss:$12 sps:$4 sm:$0xff]   ;;  %v2777_v54 = vld [vmem:[#allocation3 + $0x4cc] ss:$12 sps:$4 sm:$0xff]  }
  0x8b   :  { %2433 = vmatprep.subr.bf16.mxu1 %v2732_v56  ;;  %v2780_v56 = vld [vmem:[#allocation3 + $0x4e4] ss:$12 sps:$4 sm:$0xff]  }
  0x8d   :  { %1429 = vmatpush1.bf16.msra.mxu0 %v2649_v34  ;;  %1646 = vmatmul.mubr.bf16.vlgmr.msra.gmra.mrb[8].mxu1 %v3015_v59  ;;  %v2731_v34 = vld [vmem:[#allocation3 + $0x3dc] ss:$12 sps:$4 sm:$0xff]  }
  0x8e   :  { %1430 = vmatprep.subr.bf16.mxu0 %v2656_v35  ;;  %2434 = vmatpush3.bf16.msra.mxu1 %v2733_v60  ;;  %v2729_v35 = vld [vmem:[#allocation3 + $0x3d8] ss:$12 sps:$4 sm:$0xff]   ;;  %v2786_v60 = vld [vmem:[#allocation3 + $0x514] ss:$12 sps:$4 sm:$0xff]  }
  0x8f   :  { %2435 = vmatprep.subr.bf16.mxu1 %v2737_v61  ;;  %1685 = vmatprep.mubr.bf16.mxu1 %v3022_v10  ;;  %v2784_v61 = vld [vmem:[#allocation3 + $0x510] ss:$12 sps:$4 sm:$0xff]  }
  0x91   :  { %1431 = vmatpush1.bf16.msra.mxu0 %v2654_v38  ;;  %v2741_v38 = vld [vmem:[#allocation3 + $0x40c] ss:$12 sps:$4 sm:$0xff]  }
  0x92   :  { %1432 = vmatprep.subr.bf16.mxu0 %v2661_v39  ;;  %2436 = vmatpush3.bf16.msra.mxu1 %v2738_v0  ;;  %v2739_v39 = vld [vmem:[#allocation3 + $0x408] ss:$12 sps:$4 sm:$0xff]   ;;  %v2792_v0 = vld [vmem:[#allocation3 + $0x544] ss:$12 sps:$4 sm:$0xff]  }
  0x93   :  { %2437 = vmatprep.subr.bf16.mxu1 %v2742_v1  ;;  %v2790_v1 = vld [vmem:[#allocation3 + $0x540] ss:$12 sps:$4 sm:$0xff]  }
  0x95   :  { %1433 = vmatpush1.bf16.msra.mxu0 %v2659_v43  ;;  %v2749_v43 = vld [vmem:[#allocation3 + $0x438] ss:$12 sps:$4 sm:$0xff]  }
  0x96   :  { %1434 = vmatprep.subr.bf16.mxu0 %v2666_v45  ;;  %2438 = vmatpush3.bf16.msra.mxu1 %v2743_v4  ;;  %v2754_v45 = vld [vmem:[#allocation3 + $0x450] ss:$12 sps:$4 sm:$0xff]   ;;  %v2798_v4 = vld [vmem:[#allocation3 + $0x574] ss:$12 sps:$4 sm:$0xff]  }
  0x97   :  { %2439 = vmatprep.subr.bf16.mxu1 %v2747_v5  ;;  %v2796_v5 = vld [vmem:[#allocation3 + $0x570] ss:$12 sps:$4 sm:$0xff]  }
  0x99   :  { %1435 = vmatpush1.bf16.msra.mxu0 %v2664_v48  ;;  %v2766_v48 = vld [vmem:[#allocation3 + $0x484] ss:$12 sps:$4 sm:$0xff]  }
  0x9a   :  { %1436 = vmatprep.subr.bf16.mxu0 %v2671_v49  ;;  %2440 = vmatpush3.bf16.msra.mxu1 %v2748_v9  ;;  %v2764_v49 = vld [vmem:[#allocation3 + $0x480] ss:$12 sps:$4 sm:$0xff]  }
  0x9b   :  { %2441 = vmatprep.subr.bf16.mxu1 %v2752_v11  ;;  %v2802_v9 = vld [vmem:[#allocation3 + $0x5a0] ss:$12 sps:$4 sm:$0xff]   ;;  %v2805_v11 = vld [vmem:[#allocation3 + $0x5b8] ss:$12 sps:$4 sm:$0xff]  }
  0x9d   :  { %1437 = vmatpush1.bf16.msra.mxu0 %v2669_v52  ;;  %v2774_v52 = vld [vmem:[#allocation3 + $0x4b4] ss:$12 sps:$4 sm:$0xff]  }
  0x9e   :  { %1438 = vmatprep.subr.bf16.mxu0 %v2676_v53  ;;  %2442 = vmatpush3.bf16.msra.mxu1 %v2753_v14  ;;  %v2772_v53 = vld [vmem:[#allocation3 + $0x4b0] ss:$12 sps:$4 sm:$0xff]   ;;  %v2813_v14 = vld [vmem:[#allocation3 + $0x5ec] ss:$12 sps:$4 sm:$0xff]  }
  0x9f   :  { %2443 = vmatprep.subr.bf16.mxu1 %v2757_v15  ;;  %v2814_v15 = vld [vmem:[#allocation6 + $0x40] sm:$0xff]  }
  0xa1   :  { %1439 = vmatpush1.bf16.msra.mxu0 %v2674_v57  ;;  %v2778_v57 = vld [vmem:[#allocation3 + $0x4e0] ss:$12 sps:$4 sm:$0xff]  }
  0xa2   :  { %1440 = vmatprep.subr.bf16.mxu0 %v2681_v58  ;;  %2444 = vmatpush3.bf16.msra.mxu1 %v2758_v18  ;;  %v2783_v58 = vld [vmem:[#allocation3 + $0x4fc] ss:$12 sps:$4 sm:$0xff]  }
  0xa3   :  { %2445 = vmatprep.subr.bf16.mxu1 %v2762_v19  ;;  %v2811_v18 = vld [vmem:[#allocation3 + $0x5e8] ss:$12 sps:$4 sm:$0xff]  }
  0xa4   :  { %v2817_v19 = vld [vmem:[#allocation6 + $0x8] sm:$0xff]  }
  0xa5   :  { %1441 = vmatpush1.bf16.msra.mxu0 %v2679_v62  ;;  %v2789_v62 = vld [vmem:[#allocation3 + $0x52c] ss:$12 sps:$4 sm:$0xff]  }
  0xa6   :  { %1451 = vmatprep.subr.bf16.mxu0 %v2686_v63  ;;  %v2787_v63 = vld [vmem:[#allocation3 + $0x528] ss:$12 sps:$4 sm:$0xff]  }
  0xa8   :  { %1443 = vmatmul.mubr.bf16.vlgmr.msra.gmra.mrb[0].mxu0 %v3006_v22  ;;  %v2763_v22 = vld [vmem:[#allocation3 + $0x518] ss:$12 sps:$4 sm:$0xff]  }
  0xa9   :  { %1452 = vmatpush1.bf16.msra.mxu0 %v2684_v2  ;;  %1483 = vmatprep.mubr.bf16.mxu0 %v69_v44  ;;  %v2756_v44 = vld [vmem:[#allocation3 + $0x454] ss:$12 sps:$4 sm:$0xff]   ;;  %v2795_v2 = vld [vmem:[#allocation3 + $0x55c] ss:$12 sps:$4 sm:$0xff]  }
  0xaa   :  { %1453 = vmatprep.subr.bf16.mxu0 %v2691_v3  ;;  %2446 = vmatpush3.bf16.msra.mxu1 %v2763_v22  ;;  %v2793_v3 = vld [vmem:[#allocation3 + $0x558] ss:$12 sps:$4 sm:$0xff]  }
  0xab   :  { %2447 = vmatprep.subr.bf16.mxu1 %v2767_v23  ;;  %v2820_v22 = vld [vmem:[#allocation6 + $0x58] sm:$0xff]  }
  0xac   :  { %v2821_v23 = vld [vmem:[#allocation6 + $0x18] sm:$0xff]  }
  0xad   :  { %1454 = vmatpush1.bf16.msra.mxu0 %v2689_v6  ;;  %v2801_v6 = vld [vmem:[#allocation3 + $0x58c] ss:$12 sps:$4 sm:$0xff]  }
  0xae   :  { %1455 = vmatprep.subr.bf16.mxu0 %v2696_v8  ;;  %2448 = vmatpush3.bf16.msra.mxu1 %v2768_v26  ;;  %v2804_v8 = vld [vmem:[#allocation3 + $0x5a4] ss:$12 sps:$4 sm:$0xff]  }
  0xaf   :  { %2455 = vmatprep.subr.bf16.mxu1 %v2814_v15  ;;  %v2831_v15 = vld [vmem:[#allocation6 + $0x88] sm:$0xff]  }
  0xb1   :  { %1456 = vmatpush1.bf16.msra.mxu0 %v2694_v12  ;;  %1686 = vmatmul.mubr.bf16.vlgmr.msra.gmra.mrb[12].mxu1 %v3028_v29  ;;  %v2810_v12 = vld [vmem:[#allocation3 + $0x5d4] ss:$12 sps:$4 sm:$0xff]  }
  0xb2   :  { %1457 = vmatprep.subr.bf16.mxu0 %v2701_v13  ;;  %v2808_v13 = vld [vmem:[#allocation3 + $0x5d0] ss:$12 sps:$4 sm:$0xff]  }
  0xb5   :  { %1458 = vmatpush1.bf16.msra.mxu0 %v2699_v16  ;;  %v2815_v16 = vld [vmem:[#allocation6] sm:$0xff]  }
  0xb6   :  { %1459 = vmatprep.subr.bf16.mxu0 %v2706_v17  ;;  %v2816_v17 = vld [vmem:[#allocation6 + $0x48] sm:$0xff]   ;;  %2456 = vmatpush3.bf16.msra.mxu1 %v2815_v16  ;;  %v2832_v16 = vld [vmem:[#allocation6 + $0x90] sm:$0xff]  }
  0xb7   :  { %2457 = vmatprep.subr.bf16.mxu1 %v2816_v17  ;;  %v2833_v17 = vld [vmem:[#allocation6 + $0x98] sm:$0xff]  }
  0xb9   :  { %1460 = vmatpush1.bf16.msra.mxu0 %v2704_v20  ;;  %v2818_v20 = vld [vmem:[#allocation6 + $0x50] sm:$0xff]  }
  0xba   :  { %1461 = vmatprep.subr.bf16.mxu0 %v2711_v21  ;;  %2458 = vmatpush3.bf16.msra.mxu1 %v2817_v19  ;;  %v2819_v21 = vld [vmem:[#allocation6 + $0x10] sm:$0xff]   ;;  %v2835_v19 = vld [vmem:[#allocation6 + $0xa8] sm:$0xff]  }
  0xbb   :  { %2459 = vmatprep.subr.bf16.mxu1 %v2818_v20  ;;  %v2836_v20 = vld [vmem:[#allocation6 + $0xb0] sm:$0xff]  }
  0xbd   :  { %1462 = vmatpush1.bf16.msra.mxu0 %v2709_v24 }
  0xbe   :  { %1463 = vmatprep.subr.bf16.mxu0 %v2716_v25  ;;  %2460 = vmatpush3.bf16.msra.mxu1 %v2819_v21  ;;  %v2837_v21 = vld [vmem:[#allocation6 + $0xb8] sm:$0xff]  }
  0xbf   :  { %2461 = vmatprep.subr.bf16.mxu1 %v2820_v22 }
  0xc1   :  { %1464 = vmatpush1.bf16.msra.mxu0 %v2714_v28 }
  0xc2   :  { %1465 = vmatprep.subr.bf16.mxu0 %v2721_v30  ;;  %2462 = vmatpush3.bf16.msra.mxu1 %v2821_v23  ;;  %v330_v30 = vlaneseq  ;;  %v2839_v23 = vld [vmem:[%s3104_s5] sm:$0xff]  }
  0xc5   :  { %1466 = vmatpush1.bf16.msra.mxu0 %v2719_v31  ;;  %v331_v31 = vshrl.u32 %v330_v30, 7  ;;  %v2845_v30 = vld [vmem:[%s3104_s5 + $0x30] sm:$0xff]  }
  0xc6   :  { %1467 = vmatprep.subr.bf16.mxu0 %v2726_v32 }
  0xc7   :  { %v340_v32 = vsub.s32 2, %v331_v31 }
  0xc9   :  { %1468 = vmatpush1.bf16.msra.mxu0 %v2724_v33  ;;  %v328_v33 = vld [vmem:[%s3101_s2] sm:$0x7] }
  0xca   :  { %1469 = vmatprep.subr.bf16.mxu0 %v2731_v34  ;;  %v341_v34 = vrot.slane %v328_v33, %v340_v32 }
  0xcd   :  { %1470 = vmatpush1.bf16.msra.mxu0 %v2729_v35 }
  0xce   :  { %1471 = vmatprep.subr.bf16.mxu0 %v2736_v36 }
  0xd1   :  { %1472 = vmatpush1.bf16.msra.mxu0 %v2734_v37 }
  0xd2   :  { %1473 = vmatprep.subr.bf16.mxu0 %v2741_v38 }
  0xd5   :  { %1474 = vmatpush1.bf16.msra.mxu0 %v2739_v39 }
  0xd6   :  { %1475 = vmatprep.subr.bf16.mxu0 %v2746_v40 }
  0xd9   :  { %1476 = vmatpush1.bf16.msra.mxu0 %v2744_v41  ;;  %v2822_v41 = vld [vmem:[#allocation6 + $0x60] sm:$0xff]  }
  0xda   :  { %1477 = vmatprep.subr.bf16.mxu0 %v2751_v42  ;;  %2463 = vmatprep.subr.bf16.mxu1 %v2822_v41 }
  0xdd   :  { %1478 = vmatpush1.bf16.msra.mxu0 %v2749_v43  ;;  %v2823_v43 = vld [vmem:[#allocation6 + $0x20] sm:$0xff]  }
  0xde   :  { %1479 = vmatprep.subr.bf16.mxu0 %v2756_v44  ;;  %2464 = vmatpush3.bf16.msra.mxu1 %v2823_v43 }
  0xe1   :  { %1480 = vmatpush1.bf16.msra.mxu0 %v2754_v45 }
  0xe2   :  { %1481 = vmatprep.subr.bf16.mxu0 %v2761_v46 }
  0xe5   :  { %1482 = vmatpush1.bf16.msra.mxu0 %v2759_v47 }
  0xe6   :  { %1492 = vmatprep.subr.bf16.mxu0 %v2766_v48  ;;  %v2824_v48 = vld [vmem:[#allocation6 + $0x68] sm:$0xff]  }
  0xe7   :  { %2465 = vmatprep.subr.bf16.mxu1 %v2824_v48 }
  0xe8   :  { %1484 = vmatmul.mubr.bf16.vlgmr.msra.gmra.mrb[0].mxu0 %v3015_v59  ;;  %v2781_v59 = vld [vmem:[#allocation3 + $0x4f8] ss:$12 sps:$4 sm:$0xff]  }
  0xe9   :  { %1493 = vmatpush1.bf16.msra.mxu0 %v2764_v49  ;;  %1524 = vmatprep.mubr.bf16.mxu0 %v3022_v10  ;;  %v2807_v10 = vld [vmem:[#allocation3 + $0x5bc] ss:$12 sps:$4 sm:$0xff]  }
  0xea   :  { %1494 = vmatprep.subr.bf16.mxu0 %v2771_v50  ;;  %v2825_v50 = vld [vmem:[#allocation6 + $0x28] sm:$0xff]  }
  0xeb   :  { %2466 = vmatpush3.bf16.msra.mxu1 %v2825_v50 }
  0xed   :  { %1495 = vmatpush1.bf16.msra.mxu0 %v2769_v51  ;;  %v2826_v51 = vld [vmem:[#allocation6 + $0x70] sm:$0xff]  }
  0xee   :  { %1496 = vmatprep.subr.bf16.mxu0 %v2774_v52  ;;  %v2827_v52 = vld [vmem:[#allocation6 + $0x30] sm:$0xff]   ;;  %2467 = vmatprep.subr.bf16.mxu1 %v2826_v51 }
  0xef   :  { %2468 = vmatpush3.bf16.msra.mxu1 %v2827_v52 }
  0xf1   :  { %1497 = vmatpush1.bf16.msra.mxu0 %v2772_v53  ;;  %v2828_v53 = vld [vmem:[#allocation6 + $0x78] sm:$0xff]  }
  0xf2   :  { %1498 = vmatprep.subr.bf16.mxu0 %v2777_v54  ;;  %v2829_v54 = vld [vmem:[#allocation6 + $0x38] sm:$0xff]   ;;  %2469 = vmatprep.subr.bf16.mxu1 %v2828_v53 }
  0xf3   :  { %2470 = vmatpush3.bf16.msra.mxu1 %v2829_v54 }
  0xf5   :  { %1499 = vmatpush1.bf16.msra.mxu0 %v2775_v55  ;;  %v2927_v55 = vmov 0.0  }
  0xf6   :  { %1500 = vmatprep.subr.bf16.mxu0 %v2780_v56  ;;  %2495 = vmatprep.subr.bf16.mxu1 %v2927_v55 }
  0xf9   :  { %1501 = vmatpush1.bf16.msra.mxu0 %v2778_v57 }
  0xfa   :  { %1502 = vmatprep.subr.bf16.mxu0 %v2783_v58 }
  0xfd   :  { %1503 = vmatpush1.bf16.msra.mxu0 %v2781_v59 }
  0xfe   :  { %1504 = vmatprep.subr.bf16.mxu0 %v2786_v60 }
 0x101   :  { %1505 = vmatpush1.bf16.msra.mxu0 %v2784_v61 }
 0x102   :  { %1506 = vmatprep.subr.bf16.mxu0 %v2789_v62 }
 0x105   :  { %1507 = vmatpush1.bf16.msra.mxu0 %v2787_v63 }
 0x106   :  { %1508 = vmatprep.subr.bf16.mxu0 %v2792_v0  ;;  %v332_v0 = vsub.s32 0, %v331_v31 }
 0x109   :  { %1509 = vmatpush1.bf16.msra.mxu0 %v2790_v1  ;;  %v336_v1 = vsub.s32 1, %v331_v31  ;;  %v2846_v31 = vld [vmem:[%s3104_s5 + $0x38] sm:$0xff]  }
 0x10a   :  { %1510 = vmatprep.subr.bf16.mxu0 %v2795_v2  ;;  %v333_v2 = vrot.slane %v328_v33, %v332_v0 }
 0x10d   :  { %1511 = vmatpush1.bf16.msra.mxu0 %v2793_v3  ;;  %v337_v3 = vrot.slane %v328_v33, %v336_v1 }
 0x10e   :  { %1512 = vmatprep.subr.bf16.mxu0 %v2798_v4 }
 0x111   :  { %1513 = vmatpush1.bf16.msra.mxu0 %v2796_v5 }
 0x112   :  { %1514 = vmatprep.subr.bf16.mxu0 %v2801_v6 }
 0x115   :  { %1515 = vmatpush1.bf16.msra.mxu0 %v2799_v7 }
 0x116   :  { %1516 = vmatprep.subr.bf16.mxu0 %v2804_v8 }
 0x119   :  { %1517 = vmatpush1.bf16.msra.mxu0 %v2802_v9 }
 0x11a   :  { %1518 = vmatprep.subr.bf16.mxu0 %v2807_v10 }
 0x11d   :  { %1519 = vmatpush1.bf16.msra.mxu0 %v2805_v11 }
 0x11e   :  { %1520 = vmatprep.subr.bf16.mxu0 %v2810_v12 }
 0x120   :  { %v2383_v24 = vpop.f32.mrb[0].mxu1 }
 0x121   :  { %1521 = vmatpush1.bf16.msra.mxu0 %v2808_v13  ;;  %v2384_v25 = vpop.f32.mrb[1].mxu1 }
 0x122   :  { %1522 = vmatprep.subr.bf16.mxu0 %v2813_v14  ;;  %v2385_v26 = vadd.f32 %v2384_v25, %v2383_v24  ;;  %v2386_v27 = vpop.f32.mrb[2].mxu1  ;;  %v2830_v14 = vld [vmem:[#allocation6 + $0x80] sm:$0xff]  }
 0x123   :  { %v2387_v28 = vpop.f32.mrb[3].mxu1  ;;  %v2840_v24 = vld [vmem:[%s3104_s5 + $0x8] sm:$0xff]   ;;  %v2841_v25 = vld [vmem:[%s3104_s5 + $0x10] sm:$0xff]   ;;  %v2843_v27 = vld [vmem:[%s3104_s5 + $0x20] sm:$0xff]  }
 0x124   :  { %v1568_v35 = vadd.f32 %v2385_v26, %v341_v34  ;;  %v2842_v26 = vld [vmem:[%s3104_s5 + $0x18] sm:$0xff]   ;;  %v2844_v28 = vld [vmem:[%s3104_s5 + $0x28] sm:$0xff]  }
 0x125   :  { %1523 = vmatpush1.bf16.msra.mxu0 %v2811_v18  ;;  %v2834_v18 = vld [vmem:[#allocation6 + $0xa0] sm:$0xff]  }
 0x128   :  { %1525 = vmatmul.mubr.bf16.vlgmr.msra.gmra.mrb[0].mxu0 %v3028_v29 }
 0x140   :  { %v2405_v36 = vpop.f32.mrb[4].mxu1 }
 0x141   :  { %v2406_v29 = vpop.f32.mrb[5].mxu1 }
 0x142   :  { %v2407_v37 = vadd.f32 %v2406_v29, %v2405_v36  ;;  %v2408_v38 = vpop.f32.mrb[6].mxu1  ;;  %v2328_v29 = vld [vmem:[%s3103_s4] ss:$0 sm:$0xff]  ;;  %s2893_s4 = scalar_lea.vmem %s2125_s15, 128 }
 0x143   :  { %v2409_v39 = vpop.f32.mrb[7].mxu1  ;;  %p2894_p2 = scmp.ne.s32.totalorder %s2125_s15, %s2893_s4  ;;  %p2899_p4 = scmp.lt.s32.totalorder %s2893_s4, %s2893_s4 }
 0x144   :  { %v1608_v40 = vadd.f32 %v2407_v37, %v1568_v35 }
 0x145   :  { %p2900_p5 = por %p2899_p4, %p2898_p3 }
 0x147   :  { %p2901_p6 = pnand %p2900_p5, %p2894_p2 }
 0x160   :  { %v2427_v42 = vpop.f32.mrb[8].mxu1 }
 0x161   :  { %v2428_v44 = vpop.f32.mrb[9].mxu1 }
 0x162   :  { %v2429_v45 = vadd.f32 %v2428_v44, %v2427_v42  ;;  %v2430_v46 = vpop.f32.mrb[10].mxu1 }
 0x163   :  { %v2431_v47 = vpop.f32.mrb[11].mxu1 }
 0x164   :  { %v1648_v49 = vadd.f32 %v2429_v45, %v1608_v40  ;;  %v2356_v45 = vld [vmem:[%s3105_s6] ss:$0 sm:$0xff] }
 0x184   :  { %v2449_v56 = vpop.f32.mrb[12].mxu1 }
 0x185   :  { %v2450_v57 = vpop.f32.mrb[13].mxu1 }
 0x186   :  { %v2451_v58 = vadd.f32 %v2450_v57, %v2449_v56  ;;  %v2452_v59 = vpop.f32.mrb[14].mxu1 }
 0x187   :  { %v2453_v60 = vpop.f32.mrb[15].mxu1 }
 0x188   :  { %v1688_v61 = vadd.f32 %v2451_v58, %v1648_v49 }
 0x18a   :  { %v1695_v62 = vmax.f32 %v1688_v61, 0.0 }
 0x18c   :  { %v2366_v63 = vpack.c.bf16 %v1695_v62, %v1695_v62 }
 0x18e   :  { %1710 = vst [vmem:[#allocation2 + $0x8] sm:$0xf] %v2366_v63 }
 0x195   :  { %v2838_v22 = vld [vmem:[#allocation2 + $0x8] ss:$0 sps:$4 sm:$0xff]  }
 0x1fb   :  { %v1526_v4 = vpop.f32.mrb[0].mxu0 }
 0x1fc   :  { %v2535_v5 = vadd.f32 %v1526_v4, %v333_v2  ;;  %v1528_v6 = vpop.f32.mrb[1].mxu0 }
 0x1fd   :  { %v2536_v7 = vadd.f32 %v1528_v6, %v337_v3  ;;  %v1530_v8 = vpop.f32.mrb[2].mxu0 }
 0x1fe   :  { %v1693_v9 = vmax.f32 %v2535_v5, 0.0  ;;  %v1531_v10 = vpop.f32.mrb[3].mxu0 }
 0x1ff   :  { %v1694_v11 = vmax.f32 %v2536_v7, 0.0 }
 0x200   :  { %v2847_v12 = vpack.c.bf16 %v1693_v9, %v1693_v9 }
 0x201   :  { %v2848_v13 = vpack.c.bf16 %v1694_v11, %v1694_v11 }
 0x203   :  { %1955 = vmatprep.mubr.bf16.mxu1 %v2848_v13 }
 0x204   :  { %1956 = vmatmul.mubr.bf16.vlgmr.msra.gmra.mrb[16].mxu1 %v2847_v12 }
 0x205   :  { %2496 = vmatpush3.bf16.msra.mxu1 %v2830_v14  ;;  %2511 = vmatprep.mubr.msk.bf16.mxu1 %vm2928_vm0, %v2927_v55 }
 0x206   :  { %2497 = vmatprep.subr.bf16.mxu1 %v2927_v55 }
 0x209   :  { %2498 = vmatpush3.bf16.msra.mxu1 %v2831_v15 }
 0x20a   :  { %2499 = vmatprep.subr.bf16.mxu1 %v2927_v55 }
 0x20d   :  { %2500 = vmatpush3.bf16.msra.mxu1 %v2832_v16 }
 0x20e   :  { %2501 = vmatprep.subr.bf16.mxu1 %v2927_v55 }
 0x211   :  { %2502 = vmatpush3.bf16.msra.mxu1 %v2833_v17 }
 0x212   :  { %2503 = vmatprep.subr.bf16.mxu1 %v2927_v55 }
 0x215   :  { %2504 = vmatpush3.bf16.msra.mxu1 %v2834_v18 }
 0x216   :  { %2505 = vmatprep.subr.bf16.mxu1 %v2927_v55 }
 0x219   :  { %2506 = vmatpush3.bf16.msra.mxu1 %v2835_v19 }
 0x21a   :  { %2507 = vmatprep.subr.bf16.mxu1 %v2927_v55 }
 0x21d   :  { %2508 = vmatpush3.bf16.msra.mxu1 %v2836_v20 }
 0x21e   :  { %2509 = vmatprep.subr.bf16.mxu1 %v2927_v55 }
 0x221   :  { %2510 = vmatpush3.bf16.msra.mxu1 %v2837_v21 }
 0x222   :  { %2515 = vmatprep.subr.bf16.mxu1 %v2927_v55 }
 0x224   :  { %2512 = vmatmul.mubr.bf16.vlgmr.msra.gmra.mrb[20].mxu1 %v2838_v22 }
 0x225   :  { %2531 = vmatprep.mubr.msk.bf16.mxu1 %vm2928_vm0, %v2927_v55  ;;  %2516 = vmatpush3.bf16.msra.mxu1 %v2839_v23 }
 0x226   :  { %2517 = vmatprep.subr.bf16.mxu1 %v2927_v55 }
 0x229   :  { %2518 = vmatpush3.bf16.msra.mxu1 %v2840_v24 }
 0x22a   :  { %2519 = vmatprep.subr.bf16.mxu1 %v2927_v55 }
 0x22d   :  { %2520 = vmatpush3.bf16.msra.mxu1 %v2841_v25 }
 0x22e   :  { %2521 = vmatprep.subr.bf16.mxu1 %v2927_v55 }
 0x231   :  { %2522 = vmatpush3.bf16.msra.mxu1 %v2842_v26 }
 0x232   :  { %2523 = vmatprep.subr.bf16.mxu1 %v2927_v55 }
 0x235   :  { %2524 = vmatpush3.bf16.msra.mxu1 %v2843_v27 }
 0x236   :  { %2525 = vmatprep.subr.bf16.mxu1 %v2927_v55 }
 0x239   :  { %2526 = vmatpush3.bf16.msra.mxu1 %v2844_v28 }
 0x23a   :  { %2527 = vmatprep.subr.bf16.mxu1 %v2927_v55 }
 0x23d   :  { %2528 = vmatpush3.bf16.msra.mxu1 %v2845_v30 }
 0x23e   :  { %2529 = vmatprep.subr.bf16.mxu1 %v2927_v55 }
 0x241   :  { %2530 = vmatpush3.bf16.msra.mxu1 %v2846_v31 }
 0x2d7   :  { %v2471_v32 = vpop.f32.mrb[16].mxu1 }
 0x2d8   :  { %v2472_v33 = vpop.f32.mrb[17].mxu1 }
 0x2d9   :  { %v2473_v34 = vadd.f32 %v2472_v33, %v2471_v32  ;;  %v2474_v35 = vpop.f32.mrb[18].mxu1 }
 0x2da   :  { %v2475_v36 = vpop.f32.mrb[19].mxu1 }
 0x2db   :  { %v1958_v37 = vadd.f32 %v2473_v34, %v2328_v29 }
 0x2f7   :  { %v1997_v38 = vpop.f32.mrb[20].mxu1 }
 0x2f8   :  { %v1998_v39 = vadd.f32 %v1997_v38, %v1958_v37  ;;  %v2513_v40 = vpop.f32.mrb[21].mxu1 }
 0x2f9   :  { %v2000_v41 = vpop.f32.mrb[22].mxu1 }
 0x2fa   :  { %v2003_v42 = vmax.f32 %v1998_v39, 0.0  ;;  %v2514_v43 = vpop.f32.mrb[23].mxu1 }
 0x2fc   :  { %v2004_v44 = vpack.c.bf16 %v2003_v42, %v2003_v42 }
 0x2fe   :  { %2532 = vmatmul.mubr.bf16.vlgmr.msra.gmra.mrb[24].mxu1 %v2004_v44 }
 0x3d1   :  { %v2110_v46 = vpop.f32.mrb[24].mxu1 }
 0x3d2   :  { %v2111_v47 = vadd.f32 %v2356_v45, %v2110_v46  ;;  %v2533_v48 = vpop.f32.mrb[25].mxu1 }
 0x3d3   :  { %v2113_v49 = vpop.f32.mrb[26].mxu1 }
 0x3d4   :  { %v2534_v50 = vpop.f32.mrb[27].mxu1  ;;  %2117 = vst.msk [vmem:[#allocation8] sm:$0xff] %vm2116_vm1, %v2111_v47 }
 0x3d5   :  { %2904 = shalt.err (!%p2901_p6)
}
 0x3d6   :  { %s2905_s6 = scalar_lea.hbm %s3106_s7, 128 }
 0x3d7   :  { %p2906_p7 = scmp.ne.s32.totalorder %s3106_s7, %s2905_s6  ;;  %p2909_p8 = scmp.lt.u32.totalorder %s2905_s6, %s3106_s7 }
 0x3d9   :  { %p2911_p9 = pnand %p2909_p8, %p2906_p7 }
 0x3db   :  { %2914 = shalt.err (!%p2911_p9)
}
 0x3dc   :  { %2127 = dma.vmem_to_hbm [thread:$0]  %s2125_s15, 128, %s3106_s7, [#allocation5]  }
 0x3dd   :  { %2919 = dma.done.wait [#allocation5], 128  }
 0x3de   :  { %2920 = vsyncadd [#allocation5], 4294967168 }
 0x3df   :  { %2131 = vsyncpa [#allocation4], 1 }
 0x3e0   :  { %2132 = vsyncpa [#allocation7], 1 }
 0x3e1   :  { %2133 = vsyncpa [#allocation5], 1 }

</bundles_post_ra>
